<compile_context>
chip_gen: v6e
topology: v6e:2x2x1
jax: 0.10.0
libtpu: 0.0.40
codegen_flags: <defaults>
</compile_context>

<pallas_src>
import jax
import jax.numpy as jnp
from jax import lax
from jax.experimental import pallas as pl
from jax.experimental.pallas import tpu as pltpu


def _round_up(x, m):
    return (x + m - 1) // m * m


def _cdiv(a, b):
    return -(-a // b)


def _num_tensorcores():
    # 2 TensorCores per chip on v7x (and megacore v4/v5p); 1 on v5e/v6e.
    try:
        kind = jax.devices()[0].device_kind.lower()
    except Exception:
        return 1
    return 2 if any(m in kind for m in ("v7", "7x", "v4", "v5p")) else 1


def _conv_embed_kernel(p_ref, w_ref, b_ref, o_ref):
    # p_ref: (TM, CK_pad)   lane-dense im2col rows for this tile
    # w_ref: (CK_pad, C_out) flattened conv weight (rows zero-padded past CK)
    # b_ref: (1, C_out)      bias
    # o_ref: (TM, C_out)     output tile (no lane padding -> no post-kernel slice)
    acc = jnp.dot(p_ref[...], w_ref[...],
                  preferred_element_type=jnp.float32,
                  precision=lax.Precision.HIGHEST)
    o_ref[...] = jnp.maximum(acc + b_ref[...], 0.0).astype(o_ref.dtype)


def embedding_forward(x, weight, bias, *, kernel_size=3, overlap=1, padding=1,
                      num_row_tiles=None):
    """x: (N, C_in, L) f32; weight: (C_out, C_in, K); bias: (C_out,)
    Returns (N, L_out, C_out) f32, matching the PyTorch module's forward."""
    N, C_in, L = x.shape
    C_out, _, K = weight.shape
    stride = kernel_size - overlap
    L_out = (L + 2 * padding - kernel_size) // stride + 1
    CK = C_in * K
    M = N * L_out

    # --- im2col from K strided slices (no gather); rows ordered (k, c_in) ---
    x_pad = jnp.pad(x, ((0, 0), (0, 0), (padding, padding)))     # (N, C_in, L_pad)
    x_t = jnp.transpose(x_pad, (0, 2, 1))                        # (N, L_pad, C_in) tiny
    taps = [
        lax.slice(x_t, (0, k, 0),
                  (N, k + (L_out - 1) * stride + 1, C_in),
                  (1, stride, 1))                                # (N, L_out, C_in)
        for k in range(K)
    ]
    CK_pad = _round_up(CK, 128)          # lane-dense patch rows (full 512-B DMA lines)
    parts = taps
    if CK_pad > CK:
        parts = taps + [jnp.zeros((N, L_out, CK_pad - CK), x.dtype)]
    patches = jnp.concatenate(parts, axis=-1).reshape(M, CK_pad)

    # Flattened weight matching the (k, c_in) row order; zero-pad rows to CK_pad.
    w_mat = jnp.transpose(weight, (2, 1, 0)).reshape(CK, C_out)  # (CK, C_out)
    w_mat = jnp.pad(w_mat, ((0, CK_pad - CK), (0, 0)))           # (CK_pad, C_out)
    b_mat = bias.reshape(1, C_out)

    # --- generation-aware row tiling ---
    if num_row_tiles is None:
        num_row_tiles = 2 if (_num_tensorcores() == 2 and M >= 16) else 1
    num_row_tiles = max(num_row_tiles, _cdiv(M, 4096))   # VMEM cap for huge inputs
    if num_row_tiles == 1:
        TM, M_pad = M, M          # full-array block: exempt from the (8,128) rule
    else:
        TM = _round_up(_cdiv(M, num_row_tiles), 8)
        M_pad = num_row_tiles * TM
    if M_pad != M:
        patches = jnp.pad(patches, ((0, M_pad - M), (0, 0)))

    out = pl.pallas_call(
        _conv_embed_kernel,
        out_shape=jax.ShapeDtypeStruct((M_pad, C_out), x.dtype),
        grid_spec=pltpu.PrefetchScalarGridSpec(
            num_scalar_prefetch=0,
            grid=(num_row_tiles,),
            in_specs=[
                pl.BlockSpec((TM, CK_pad), lambda i: (i, 0)),
                pl.BlockSpec((CK_pad, C_out), lambda i: (0, 0)),   # VMEM-resident
                pl.BlockSpec((1, C_out), lambda i: (0, 0)),        # VMEM-resident
            ],
            out_specs=pl.BlockSpec((TM, C_out), lambda i: (i, 0)),
        ),
        compiler_params=pltpu.CompilerParams(
            dimension_semantics=("parallel",)),
    )(patches, w_mat, b_mat)

    if M_pad != M:
        out = out[:M]   # leading-dim slice only (padded rows are ReLU(bias), dropped)
    return out.reshape(N, L_out, C_out)


def _reference(x, weight, bias, *, kernel_size=3, overlap=1, padding=1):
    # Pure-JAX reference of Conv1d + ReLU + permute for verification.
    stride = kernel_size - overlap
    out = lax.conv_general_dilated(
        x, weight,
        window_strides=(stride,),
        padding=[(padding, padding)],
        dimension_numbers=("NCH", "OIH", "NCH"),
    )
    out = out + bias[None, :, None]
    out = jnp.maximum(out, 0.0)
    return jnp.transpose(out, (0, 2, 1))  # (N, L_out, C_out)


if __name__ == "__main__":
    kernel_size, overlap, padding = 3, 1, 1

    # (N, C_in, L, C_out, forced_num_row_tiles or None)
    configs = [
        (2, 1, 16, 50, None),     # default-module tiny case
        (2, 1, 1040, 50, None),   # longer sequence (one tile on single-TC chips)
        (2, 3, 64, 50, None),     # multi-channel input
        (3, 1, 16, 50, 2),        # forces the multi-tile + row-padding path
    ]

    key = jax.random.PRNGKey(0)
    for (N, C_in, L, C_out, forced_tiles) in configs:
        key, k_x, k_w, k_b = jax.random.split(key, 4)
        x = jax.random.normal(k_x, (N, C_in, L), dtype=jnp.float32)
        weight = 0.1 * jax.random.normal(
            k_w, (C_out, C_in, kernel_size), dtype=jnp.float32)
        bias = 0.1 * jax.random.normal(k_b, (C_out,), dtype=jnp.float32)

        out = embedding_forward(x, weight, bias,
                                kernel_size=kernel_size, overlap=overlap,
                                padding=padding, num_row_tiles=forced_tiles)
        out = jax.block_until_ready(out)

        ref = _reference(x, weight, bias,
                         kernel_size=kernel_size, overlap=overlap,
                         padding=padding)
        assert out.shape == ref.shape, (out.shape, ref.shape)
        assert jnp.allclose(out, ref, atol=1e-5, rtol=1e-5), \
            f"mismatch vs reference for config {(N, C_in, L, C_out)}"

    print("KERNEL_OK")
</pallas_src>

<mosaic_0001>
module attributes {stable_mosaic.version = 11 : i64} {
  func.func @_conv_embed_kernel(%arg0: i32, %arg1: memref<16x128xf32, #tpu.memory_space<vmem>>, %arg2: memref<128x50xf32, #tpu.memory_space<vmem>>, %arg3: memref<1x50xf32, #tpu.memory_space<vmem>>, %arg4: memref<16x50xf32, #tpu.memory_space<vmem>>) attributes {dimension_semantics = [#tpu.dimension_semantics<parallel>], iteration_bounds = array<i64: 1>, scalar_prefetch = 0 : i64, scratch_operands = 0 : i64, tpu.core_type = #tpu.core_type<tc>, window_params = [{transform_indices = @transform_0, window_bounds = array<i64: 16, 128>}, {pipeline_mode = #tpu.pipeline_mode<synchronous>, transform_indices = @transform_1, window_bounds = array<i64: 128, 50>}, {pipeline_mode = #tpu.pipeline_mode<synchronous>, transform_indices = @transform_2, window_bounds = array<i64: 1, 50>}, {transform_indices = @transform_3, window_bounds = array<i64: 16, 50>}]} {
    %c0 = arith.constant 0 : index
    %c0_0 = arith.constant 0 : index
    %0 = vector.load %arg1[%c0, %c0_0] : memref<16x128xf32, #tpu.memory_space<vmem>>, vector<16x128xf32>
    %c0_1 = arith.constant 0 : index
    %c0_2 = arith.constant 0 : index
    %1 = vector.load %arg2[%c0_1, %c0_2] : memref<128x50xf32, #tpu.memory_space<vmem>>, vector<128x50xf32>
    %cst = arith.constant dense<0.000000e+00> : vector<16x50xf32>
    %2 = tpu.matmul %0, %1, %cst {dimension_numbers = #tpu.dot_dimension_numbers<[1], [0], [0], [1], [0, 0, 1, 1], [], []>, precision = #tpu.contract_precision<fp32>} : vector<16x128xf32>, vector<128x50xf32>, vector<16x50xf32> -> vector<16x50xf32>
    %c0_3 = arith.constant 0 : index
    %c0_4 = arith.constant 0 : index
    %3 = vector.load %arg3[%c0_3, %c0_4] : memref<1x50xf32, #tpu.memory_space<vmem>>, vector<1x50xf32>
    %4 = vector.broadcast %3 : vector<1x50xf32> to vector<16x50xf32>
    %5 = arith.addf %2, %4 : vector<16x50xf32>
    %cst_5 = arith.constant 0.000000e+00 : f32
    %6 = vector.broadcast %cst_5 : f32 to vector<16x50xf32>
    %7 = arith.maximumf %5, %6 : vector<16x50xf32>
    %c0_6 = arith.constant 0 : index
    %c0_7 = arith.constant 0 : index
    %8 = vector.load %arg4[%c0_6, %c0_7] : memref<16x50xf32, #tpu.memory_space<vmem>>, vector<16x50xf32>
    tpu.vector_store %arg4[%c0_6, %c0_7], %7 {strides = array<i32>} : memref<16x50xf32, #tpu.memory_space<vmem>>, vector<16x50xf32>,
    return
  }
  func.func @transform_0(%arg0: i32) -> (i32, i32) {
    %c0_i32 = arith.constant 0 : i32
    %c0_i32_0 = arith.constant 0 : i32
    return %arg0, %c0_i32 : i32, i32
  }
  func.func @transform_1(%arg0: i32) -> (i32, i32) {
    %c0_i32 = arith.constant 0 : i32
    %c0_i32_0 = arith.constant 0 : i32
    %c0_i32_1 = arith.constant 0 : i32
    return %c0_i32, %c0_i32_0 : i32, i32
  }
  func.func @transform_2(%arg0: i32) -> (i32, i32) {
    %c0_i32 = arith.constant 0 : i32
    %c0_i32_0 = arith.constant 0 : i32
    %c0_i32_1 = arith.constant 0 : i32
    return %c0_i32, %c0_i32_0 : i32, i32
  }
  func.func @transform_3(%arg0: i32) -> (i32, i32) {
    %c0_i32 = arith.constant 0 : i32
    %c0_i32_0 = arith.constant 0 : i32
    return %arg0, %c0_i32 : i32, i32
  }
}

</mosaic_0001>

<bundles_post_ra>
// kernel: tpu_custom_call.1
= control target key start
LH: loop header
LB: loop body
LE: loop exit
PB: predicated region body
PF: predicated region fallthrough
CT: control target
= control target key end

     0   :  { %s1522_s0 = inlined_call_operand.vmem [shape: f32[16,128], index: 0, kind: input, shape index: {}]   ;;  %s1523_s1 = inlined_call_operand.vmem [shape: f32[128,50], index: 1, kind: input, shape index: {}]   ;;  %s1524_s2 = inlined_call_operand.vmem [shape: f32[1,50], index: 2, kind: input, shape index: {}]   ;;  %s1525_s3 = inlined_call_operand.hbm [shape: f32[16,50], index: 3, kind: output, shape index: {}]  }
   0x1   :  { %v32_v0 = vld [vmem:[%s1523_s1 + $0x78] sm:$0xff]  ;;  %v31_v1 = vld [vmem:[%s1523_s1 + $0x70] sm:$0xff]  ;;  %v30_v2 = vld [vmem:[%s1523_s1 + $0x68] sm:$0xff] }
   0x2   :  { %v1121_v3 = vand.u32 4294901760, %v32_v0  ;;  %v1123_v4 = vand.u32 4294901760, %v31_v1  ;;  %v1125_v5 = vand.u32 4294901760, %v30_v2  ;;  %v29_v6 = vld [vmem:[%s1523_s1 + $0x60] sm:$0xff]  ;;  %v28_v7 = vld [vmem:[%s1523_s1 + $0x58] sm:$0xff]  ;;  %v27_v8 = vld [vmem:[%s1523_s1 + $0x50] sm:$0xff] }
   0x3   :  { %v1136_v9 = vand.u32 4294901760, %v29_v6  ;;  %v1138_v10 = vand.u32 4294901760, %v28_v7  ;;  %v1140_v11 = vand.u32 4294901760, %v27_v8  ;;  %v26_v12 = vld [vmem:[%s1523_s1 + $0x48] sm:$0xff]  ;;  %v25_v13 = vld [vmem:[%s1523_s1 + $0x40] sm:$0xff]  ;;  %v24_v18 = vld [vmem:[%s1523_s1 + $0x38] sm:$0xff] }
   0x4   :  { %854 = vmatprep.subr.mxu0 %v1121_v3  ;;  %v1150_v14 = vsub.f32 %v32_v0, %v1121_v3  ;;  %v1153_v15 = vsub.f32 %v31_v1, %v1123_v4  ;;  %v1155_v16 = vand.u32 4294901760, %v26_v12  ;;  %v1158_v17 = vsub.f32 %v30_v2, %v1125_v5  ;;  %v23_v25 = vld [vmem:[%s1523_s1 + $0x30] sm:$0xff] }
   0x5   :  { %855 = vmatpush3.msra.mxu0 %v1121_v3  ;;  %v1165_v19 = vsub.f32 %v29_v6, %v1136_v9  ;;  %v1168_v20 = vsub.f32 %v28_v7, %v1138_v10  ;;  %v1180_v24 = vand.u32 4294901760, %v25_v13  ;;  %v1189_v27 = vand.u32 4294901760, %v24_v18 }
   0x6   :  { %856 = vmatprep.subr.mxu0 %v1123_v4  ;;  %v1172_v21 = vand.u32 4294901760, %v1150_v14  ;;  %v1175_v22 = vand.u32 4294901760, %v1153_v15  ;;  %v1178_v23 = vand.u32 4294901760, %v1158_v17  ;;  %v1195_v29 = vsub.f32 %v27_v8, %v1140_v11 }
   0x7   :  { %857 = vmatpush3.msra.mxu0 %v1123_v4  ;;  %v1187_v26 = vand.u32 4294901760, %v1165_v19  ;;  %v1192_v28 = vand.u32 4294901760, %v1168_v20 }
   0x8   :  { %8 = vsyncpa [#allocation3], 0  ;;  %858 = vmatprep.subr.mxu0 %v1125_v5  ;;  %v145_v30 = vsub.f32 %v1150_v14, %v1172_v21  ;;  %v152_v31 = vsub.f32 %v1153_v15, %v1175_v22  ;;  %v159_v32 = vsub.f32 %v1158_v17, %v1178_v23  ;;  %v1205_v33 = vsub.f32 %v26_v12, %v1155_v16  ;;  %v22_v35 = vld [vmem:[%s1523_s1 + $0x28] sm:$0xff]  ;;  %v21_v40 = vld [vmem:[%s1523_s1 + $0x20] sm:$0xff] }
   0x9   :  { %859 = vmatpush3.msra.mxu0 %v1125_v5  ;;  %v1208_v34 = vand.u32 4294901760, %v23_v25  ;;  %v166_v38 = vsub.f32 %v1165_v19, %v1187_v26  ;;  %v1217_v39 = vand.u32 4294901760, %v1195_v29  ;;  %v173_v41 = vsub.f32 %v1168_v20, %v1192_v28  ;;  %v20_v48 = vld [vmem:[%s1523_s1 + $0x18] sm:$0xff]  ;;  %v15_v49 = vld [vmem:[%s1522_s0] sm:$0xff]  ;;  %v16_v54 = vld [vmem:[%s1522_s0 + $0x8] sm:$0xff] }
   0xa   :  { %860 = vmatprep.subr.mxu0 %v1136_v9  ;;  %v146_v36 = vand.u32 4294901760, %v145_v30  ;;  %v153_v37 = vand.u32 4294901760, %v152_v31  ;;  %v1226_v42 = vand.u32 4294901760, %v1205_v33  ;;  %v1229_v43 = vsub.f32 %v25_v13, %v1180_v24  ;;  %v19_v59 = vld [vmem:[%s1523_s1 + $0x10] sm:$0xff]  ;;  %v18_v2 = vld [vmem:[%s1523_s1 + $0x8] sm:$0xff] }
   0xb   :  { %861 = vmatpush3.msra.mxu0 %v1136_v9  ;;  %v160_v44 = vand.u32 4294901760, %v159_v32  ;;  %v1232_v45 = vand.u32 4294901760, %v22_v35  ;;  %v1235_v46 = vsub.f32 %v24_v18, %v1189_v27  ;;  %v1238_v47 = vand.u32 4294901760, %v21_v40  ;;  %v17_v18 = vld [vmem:[%s1523_s1] sm:$0xff] }
   0xc   :  { %862 = vmatprep.subr.mxu0 %v1138_v10  ;;  %889 = vmatprep.subr.mxu1 %v146_v36  ;;  %v167_v50 = vand.u32 4294901760, %v166_v38  ;;  %v180_v51 = vsub.f32 %v1195_v29, %v1217_v39  ;;  %v1250_v52 = vand.u32 4294901760, %v1229_v43  ;;  %v1253_v53 = vsub.f32 %v23_v25, %v1208_v34 }
   0xd   :  { %863 = vmatpush3.msra.mxu0 %v1138_v10  ;;  %890 = vmatpush3.msra.mxu1 %v146_v36  ;;  %v174_v55 = vand.u32 4294901760, %v173_v41  ;;  %v187_v56 = vsub.f32 %v1205_v33, %v1226_v42  ;;  %v1262_v57 = vand.u32 4294901760, %v20_v48  ;;  %v1265_v58 = vand.u32 4294901760, %v1235_v46 }
   0xe   :  { %864 = vmatprep.subr.mxu0 %v1140_v11  ;;  %891 = vmatprep.subr.mxu1 %v153_v37  ;;  %v1271_v60 = vsub.f32 %v22_v35, %v1232_v45  ;;  %v1273_v61 = vand.u32 4294901760, %v15_v49  ;;  %v1276_v62 = vand.u32 4294901760, %v16_v54  ;;  %v181_v63 = vand.u32 4294901760, %v180_v51 }
   0xf   :  { %865 = vmatpush3.msra.mxu0 %v1140_v11  ;;  %892 = vmatpush3.msra.mxu1 %v153_v37  ;;  %v194_v0 = vsub.f32 %v1229_v43, %v1250_v52  ;;  %v1282_v1 = vand.u32 4294901760, %v1253_v53  ;;  %v1288_v6 = vsub.f32 %v21_v40, %v1238_v47  ;;  %v188_v7 = vand.u32 4294901760, %v187_v56 }
  0x10   :  { %866 = vmatprep.subr.mxu0 %v1155_v16  ;;  %893 = vmatprep.subr.mxu1 %v160_v44  ;;  %v1291_v8 = vand.u32 4294901760, %v19_v59  ;;  %v201_v12 = vsub.f32 %v1235_v46, %v1265_v58  ;;  %v1297_v13 = vand.u32 4294901760, %v1271_v60  ;;  %v1303_v25 = vsub.f32 %v15_v49, %v1273_v61 }
  0x11   :  { %867 = vmatpush3.msra.mxu0 %v1155_v16  ;;  %894 = vmatpush3.msra.mxu1 %v160_v44  ;;  %v1306_v30 = vsub.f32 %v20_v48, %v1262_v57  ;;  %v1309_v31 = vand.u32 4294901760, %v18_v2  ;;  %v1312_v32 = vsub.f32 %v16_v54, %v1276_v62  ;;  %v195_v35 = vand.u32 4294901760, %v194_v0 }
  0x12   :  { %868 = vmatprep.subr.mxu0 %v1180_v24  ;;  %895 = vmatprep.subr.mxu1 %v167_v50  ;;  %v208_v36 = vsub.f32 %v1253_v53, %v1282_v1  ;;  %v1318_v37 = vand.u32 4294901760, %v1288_v6  ;;  %v1321_v38 = vand.u32 4294901760, %v17_v18  ;;  %v1324_v40 = vsub.f32 %v19_v59, %v1291_v8 }
  0x13   :  { %869 = vmatpush3.msra.mxu0 %v1180_v24  ;;  %896 = vmatpush3.msra.mxu1 %v167_v50  ;;  %v202_v41 = vand.u32 4294901760, %v201_v12  ;;  %v215_v44 = vsub.f32 %v1271_v60, %v1297_v13  ;;  %v1527_v48 = vand.u32 4294901760, %v1303_v25  ;;  %v1331_v49 = vand.u32 4294901760, %v1306_v30 }
  0x14   :  { %870 = vmatprep.subr.mxu0 %v1189_v27  ;;  %897 = vmatprep.subr.mxu1 %v174_v55  ;;  %v1526_v50 = vand.u32 4294901760, %v1312_v32  ;;  %v1336_v51 = vsub.f32 %v18_v2, %v1309_v31  ;;  %v209_v54 = vand.u32 4294901760, %v208_v36  ;;  %v1343_v56 = vand.u32 4294901760, %v1324_v40 }
  0x15   :  { %871 = vmatpush3.msra.mxu0 %v1189_v27  ;;  %898 = vmatpush3.msra.mxu1 %v174_v55  ;;  %v222_v55 = vsub.f32 %v1288_v6, %v1318_v37  ;;  %v1346_v59 = vsub.f32 %v17_v18, %v1321_v38  ;;  %v124_v0 = vsub.f32 %v1303_v25, %v1527_v48  ;;  %vm726_vm0 = vcmask 408576  }
  0x16   :  { %872 = vmatprep.subr.mxu0 %v1208_v34  ;;  %899 = vmatprep.subr.mxu1 %v181_v63  ;;  %v229_v2 = vsub.f32 %v1306_v30, %v1331_v49  ;;  %v1359_v12 = vand.u32 4294901760, %v1336_v51 }
  0x17   :  { %873 = vmatpush3.msra.mxu0 %v1208_v34  ;;  %900 = vmatpush3.msra.mxu1 %v181_v63  ;;  %v216_v63 = vand.u32 4294901760, %v215_v44  ;;  %v223_v18 = vand.u32 4294901760, %v222_v55  ;;  %v1366_v36 = vand.u32 4294901760, %v1346_v59 }
  0x18   :  { %874 = vmatprep.subr.mxu0 %v1232_v45  ;;  %901 = vmatprep.subr.mxu1 %v188_v7  ;;  %v230_v44 = vand.u32 4294901760, %v229_v2  ;;  %v243_v55 = vsub.f32 %v1336_v51, %v1359_v12 }
  0x19   :  { %875 = vmatpush3.msra.mxu0 %v1232_v45  ;;  %902 = vmatpush3.msra.mxu1 %v188_v7  ;;  %v134_v7 = vsub.f32 %v1312_v32, %v1526_v50  ;;  %v250_v48 = vsub.f32 %v1346_v59, %v1366_v36 }
  0x1a   :  { %876 = vmatprep.subr.mxu0 %v1238_v47  ;;  %903 = vmatprep.subr.mxu1 %v195_v35 }
  0x1b   :  { %877 = vmatpush3.msra.mxu0 %v1238_v47  ;;  %904 = vmatpush3.msra.mxu1 %v195_v35  ;;  %v236_v35 = vsub.f32 %v1324_v40, %v1343_v56  ;;  %v135_v50 = vand.u32 4294901760, %v134_v7 }
  0x1c   :  { %878 = vmatprep.subr.mxu0 %v1262_v57  ;;  %905 = vmatprep.subr.mxu1 %v202_v41 }
  0x1d   :  { %879 = vmatpush3.msra.mxu0 %v1262_v57  ;;  %906 = vmatpush3.msra.mxu1 %v202_v41  ;;  %v125_v41 = vand.u32 4294901760, %v124_v0  ;;  %v251_v0 = vand.u32 4294901760, %v250_v48 }
  0x1e   :  { %880 = vmatprep.subr.mxu0 %v1291_v8  ;;  %907 = vmatprep.subr.mxu1 %v209_v54 }
  0x1f   :  { %881 = vmatpush3.msra.mxu0 %v1291_v8  ;;  %908 = vmatpush3.msra.mxu1 %v209_v54  ;;  %v237_v54 = vand.u32 4294901760, %v236_v35 }
  0x20   :  { %882 = vmatprep.subr.mxu0 %v1309_v31  ;;  %909 = vmatprep.subr.mxu1 %v216_v63 }
  0x21   :  { %883 = vmatpush3.msra.mxu0 %v1309_v31  ;;  %910 = vmatpush3.msra.mxu1 %v216_v63  ;;  %v244_v63 = vand.u32 4294901760, %v243_v55 }
  0x22   :  { %884 = vmatprep.subr.mxu0 %v1321_v38  ;;  %911 = vmatprep.subr.mxu1 %v223_v18 }
  0x23   :  { %885 = vmatpush3.msra.mxu0 %v1321_v38  ;;  %912 = vmatpush3.msra.mxu1 %v223_v18 }
  0x24   :  { %886 = vmatprep.mubr.f32.mxu0 %v125_v41  ;;  %913 = vmatprep.subr.mxu1 %v230_v44 }
  0x25   :  { %924 = vmatprep.subr.mxu0 %v1150_v14  ;;  %887 = vmatmul.mubr.f32.vlgmr.msra.gmra.mxu0 %v135_v50 }
  0x26   :  { %914 = vmatpush3.msra.mxu1 %v230_v44  ;;  %925 = vmatpush3.msra.mxu0 %v1150_v14  ;;  %v1528_v14 = vand.u32 4294901760, %v1303_v25 }
  0x27   :  { %915 = vmatprep.subr.mxu1 %v237_v54  ;;  %926 = vmatprep.subr.mxu0 %v1153_v15 }
  0x28   :  { %916 = vmatpush3.msra.mxu1 %v237_v54  ;;  %927 = vmatpush3.msra.mxu0 %v1153_v15  ;;  %v1529_v15 = vand.u32 4294901760, %v1312_v32 }
  0x29   :  { %917 = vmatprep.subr.mxu1 %v244_v63  ;;  %928 = vmatprep.subr.mxu0 %v1158_v17 }
  0x2a   :  { %918 = vmatpush3.msra.mxu1 %v244_v63  ;;  %929 = vmatpush3.msra.mxu0 %v1158_v17 }
  0x2b   :  { %919 = vmatprep.subr.mxu1 %v251_v0  ;;  %930 = vmatprep.subr.mxu0 %v1165_v19 }
  0x2c   :  { %920 = vmatpush3.msra.mxu1 %v251_v0  ;;  %921 = vmatprep.mubr.f32.mxu1 %v1273_v61 }
  0x2d   :  { %931 = vmatpush3.msra.mxu0 %v1165_v19  ;;  %922 = vmatmul.mubr.f32.vlgmr.msra.gmra.mxu1 %v1276_v62 }
  0x2e   :  { %932 = vmatprep.subr.mxu0 %v1168_v20  ;;  %959 = vmatprep.subr.mxu1 %v1121_v3 }
  0x2f   :  { %933 = vmatpush3.msra.mxu0 %v1168_v20  ;;  %960 = vmatpush3.msra.mxu1 %v1121_v3 }
  0x30   :  { %934 = vmatprep.subr.mxu0 %v1195_v29  ;;  %961 = vmatprep.subr.mxu1 %v1123_v4 }
  0x31   :  { %935 = vmatpush3.msra.mxu0 %v1195_v29  ;;  %962 = vmatpush3.msra.mxu1 %v1123_v4 }
  0x32   :  { %936 = vmatprep.subr.mxu0 %v1205_v33  ;;  %963 = vmatprep.subr.mxu1 %v1125_v5 }
  0x33   :  { %937 = vmatpush3.msra.mxu0 %v1205_v33  ;;  %964 = vmatpush3.msra.mxu1 %v1125_v5 }
  0x34   :  { %938 = vmatprep.subr.mxu0 %v1229_v43  ;;  %965 = vmatprep.subr.mxu1 %v1136_v9 }
  0x35   :  { %939 = vmatpush3.msra.mxu0 %v1229_v43  ;;  %966 = vmatpush3.msra.mxu1 %v1136_v9 }
  0x36   :  { %940 = vmatprep.subr.mxu0 %v1235_v46  ;;  %967 = vmatprep.subr.mxu1 %v1138_v10 }
  0x37   :  { %941 = vmatpush3.msra.mxu0 %v1235_v46  ;;  %968 = vmatpush3.msra.mxu1 %v1138_v10 }
  0x38   :  { %942 = vmatprep.subr.mxu0 %v1253_v53  ;;  %969 = vmatprep.subr.mxu1 %v1140_v11 }
  0x39   :  { %943 = vmatpush3.msra.mxu0 %v1253_v53  ;;  %970 = vmatpush3.msra.mxu1 %v1140_v11 }
  0x3a   :  { %944 = vmatprep.subr.mxu0 %v1271_v60  ;;  %971 = vmatprep.subr.mxu1 %v1155_v16 }
  0x3b   :  { %945 = vmatpush3.msra.mxu0 %v1271_v60  ;;  %972 = vmatpush3.msra.mxu1 %v1155_v16 }
  0x3c   :  { %946 = vmatprep.subr.mxu0 %v1288_v6  ;;  %973 = vmatprep.subr.mxu1 %v1180_v24 }
  0x3d   :  { %947 = vmatpush3.msra.mxu0 %v1288_v6  ;;  %974 = vmatpush3.msra.mxu1 %v1180_v24 }
  0x3e   :  { %948 = vmatprep.subr.mxu0 %v1306_v30  ;;  %975 = vmatprep.subr.mxu1 %v1189_v27 }
  0x3f   :  { %949 = vmatpush3.msra.mxu0 %v1306_v30  ;;  %976 = vmatpush3.msra.mxu1 %v1189_v27 }
  0x40   :  { %950 = vmatprep.subr.mxu0 %v1324_v40  ;;  %977 = vmatprep.subr.mxu1 %v1208_v34 }
  0x41   :  { %951 = vmatpush3.msra.mxu0 %v1324_v40  ;;  %978 = vmatpush3.msra.mxu1 %v1208_v34 }
  0x42   :  { %952 = vmatprep.subr.mxu0 %v1336_v51  ;;  %979 = vmatprep.subr.mxu1 %v1232_v45 }
  0x43   :  { %953 = vmatpush3.msra.mxu0 %v1336_v51  ;;  %980 = vmatpush3.msra.mxu1 %v1232_v45 }
  0x44   :  { %954 = vmatprep.subr.mxu0 %v1346_v59  ;;  %981 = vmatprep.subr.mxu1 %v1238_v47 }
  0x45   :  { %955 = vmatpush3.msra.mxu0 %v1346_v59  ;;  %956 = vmatprep.mubr.f32.mxu0 %v1303_v25 }
  0x46   :  { %982 = vmatpush3.msra.mxu1 %v1238_v47  ;;  %957 = vmatmul.mubr.f32.vlgmr.msra.gmra.mxu0 %v1312_v32 }
  0x47   :  { %983 = vmatprep.subr.mxu1 %v1262_v57  ;;  %994 = vmatprep.subr.mxu0 %v1172_v21 }
  0x48   :  { %984 = vmatpush3.msra.mxu1 %v1262_v57  ;;  %995 = vmatpush3.msra.mxu0 %v1172_v21 }
  0x49   :  { %985 = vmatprep.subr.mxu1 %v1291_v8  ;;  %996 = vmatprep.subr.mxu0 %v1175_v22 }
  0x4a   :  { %986 = vmatpush3.msra.mxu1 %v1291_v8  ;;  %997 = vmatpush3.msra.mxu0 %v1175_v22 }
  0x4b   :  { %987 = vmatprep.subr.mxu1 %v1309_v31  ;;  %998 = vmatprep.subr.mxu0 %v1178_v23 }
  0x4c   :  { %988 = vmatpush3.msra.mxu1 %v1309_v31  ;;  %999 = vmatpush3.msra.mxu0 %v1178_v23 }
  0x4d   :  { %989 = vmatprep.subr.mxu1 %v1321_v38  ;;  %1000 = vmatprep.subr.mxu0 %v1187_v26 }
  0x4e   :  { %990 = vmatpush3.msra.mxu1 %v1321_v38  ;;  %991 = vmatprep.mubr.f32.mxu1 %v1528_v14 }
  0x4f   :  { %1001 = vmatpush3.msra.mxu0 %v1187_v26  ;;  %992 = vmatmul.mubr.f32.vlgmr.msra.gmra.mxu1 %v1529_v15 }
  0x50   :  { %1002 = vmatprep.subr.mxu0 %v1192_v28  ;;  %1029 = vmatprep.subr.mxu1 %v1121_v3 }
  0x51   :  { %1003 = vmatpush3.msra.mxu0 %v1192_v28  ;;  %1030 = vmatpush3.msra.mxu1 %v1121_v3 }
  0x52   :  { %1004 = vmatprep.subr.mxu0 %v1217_v39  ;;  %1031 = vmatprep.subr.mxu1 %v1123_v4 }
  0x53   :  { %1005 = vmatpush3.msra.mxu0 %v1217_v39  ;;  %1032 = vmatpush3.msra.mxu1 %v1123_v4  ;;  %v745_v4 = vld [vmem:[%s1524_s2] ss:$0 sm:$0xff]  ;;  %s1089_s2 = smov [#allocation2]  }
  0x54   :  { %1006 = vmatprep.subr.mxu0 %v1226_v42  ;;  %1033 = vmatprep.subr.mxu1 %v1125_v5  ;;  %s734_s21 = sshll.u32 %s1089_s2, 4  ;;  %s735_s21 = int_to_ptr.vmem [resolvable:$true] %s734_s21 }
  0x55   :  { %1007 = vmatpush3.msra.mxu0 %v1226_v42  ;;  %1034 = vmatpush3.msra.mxu1 %v1125_v5  ;;  %s1067_s22 = scalar_lea.vmem %s735_s21, 256  ;;  %p1072_p1 = scmp.lt.s32.totalorder %s735_s21, %s735_s21 }
  0x56   :  { %1008 = vmatprep.subr.mxu0 %v1250_v52  ;;  %1035 = vmatprep.subr.mxu1 %v1136_v9  ;;  %p1068_p0 = scmp.ne.s32.totalorder %s735_s21, %s1067_s22  ;;  %p1073_p2 = scmp.lt.s32.totalorder %s1067_s22, %s1067_s22 }
  0x57   :  { %1009 = vmatpush3.msra.mxu0 %v1250_v52  ;;  %1036 = vmatpush3.msra.mxu1 %v1136_v9 }
  0x58   :  { %1010 = vmatprep.subr.mxu0 %v1265_v58  ;;  %1037 = vmatprep.subr.mxu1 %v1138_v10  ;;  %p1074_p3 = por %p1073_p2, %p1072_p1 }
  0x59   :  { %1011 = vmatpush3.msra.mxu0 %v1265_v58  ;;  %1038 = vmatpush3.msra.mxu1 %v1138_v10 }
  0x5a   :  { %1012 = vmatprep.subr.mxu0 %v1282_v1  ;;  %1039 = vmatprep.subr.mxu1 %v1140_v11  ;;  %p1075_p4 = pnand %p1074_p3, %p1068_p0 }
  0x5b   :  { %1013 = vmatpush3.msra.mxu0 %v1282_v1  ;;  %1040 = vmatpush3.msra.mxu1 %v1140_v11 }
  0x5c   :  { %1014 = vmatprep.subr.mxu0 %v1297_v13  ;;  %1041 = vmatprep.subr.mxu1 %v1155_v16 }
  0x5d   :  { %1015 = vmatpush3.msra.mxu0 %v1297_v13  ;;  %1042 = vmatpush3.msra.mxu1 %v1155_v16 }
  0x5e   :  { %1016 = vmatprep.subr.mxu0 %v1318_v37  ;;  %1043 = vmatprep.subr.mxu1 %v1180_v24 }
  0x5f   :  { %1017 = vmatpush3.msra.mxu0 %v1318_v37  ;;  %1044 = vmatpush3.msra.mxu1 %v1180_v24 }
  0x60   :  { %1018 = vmatprep.subr.mxu0 %v1331_v49  ;;  %1045 = vmatprep.subr.mxu1 %v1189_v27 }
  0x61   :  { %1019 = vmatpush3.msra.mxu0 %v1331_v49  ;;  %1046 = vmatpush3.msra.mxu1 %v1189_v27 }
  0x62   :  { %1020 = vmatprep.subr.mxu0 %v1343_v56  ;;  %1047 = vmatprep.subr.mxu1 %v1208_v34 }
  0x63   :  { %1021 = vmatpush3.msra.mxu0 %v1343_v56  ;;  %1048 = vmatpush3.msra.mxu1 %v1208_v34 }
  0x64   :  { %1022 = vmatprep.subr.mxu0 %v1359_v12  ;;  %1049 = vmatprep.subr.mxu1 %v1232_v45 }
  0x65   :  { %1023 = vmatpush3.msra.mxu0 %v1359_v12  ;;  %1050 = vmatpush3.msra.mxu1 %v1232_v45 }
  0x66   :  { %1024 = vmatprep.subr.mxu0 %v1366_v36  ;;  %1051 = vmatprep.subr.mxu1 %v1238_v47 }
  0x67   :  { %1025 = vmatpush3.msra.mxu0 %v1366_v36  ;;  %1026 = vmatprep.mubr.f32.mxu0 %v1273_v61 }
  0x68   :  { %1052 = vmatpush3.msra.mxu1 %v1238_v47  ;;  %1027 = vmatmul.mubr.f32.vlgmr.msra.gmra.mxu0 %v1276_v62 }
  0x69   :  { %1053 = vmatprep.subr.mxu1 %v1262_v57  ;;  %1061 = vmatprep.mubr.f32.mxu1 %v1273_v61 }
  0x6a   :  { %1054 = vmatpush3.msra.mxu1 %v1262_v57 }
  0x6b   :  { %1055 = vmatprep.subr.mxu1 %v1291_v8 }
  0x6c   :  { %1056 = vmatpush3.msra.mxu1 %v1291_v8 }
  0x6d   :  { %1057 = vmatprep.subr.mxu1 %v1309_v31 }
  0x6e   :  { %1058 = vmatpush3.msra.mxu1 %v1309_v31 }
  0x6f   :  { %1059 = vmatprep.subr.mxu1 %v1321_v38 }
  0x70   :  { %1060 = vmatpush3.msra.mxu1 %v1321_v38 }
  0x71   :  { %1062 = vmatmul.mubr.f32.vlgmr.msra.gmra.mxu1 %v1276_v62 }
  0xe5   :  { %v888_v3 = vpop.f32.mrf.mxu0 }
  0xe6   :  { %v138_v11 = vadd.f32 %v888_v3, %v745_v4 }
  0xe7   :  { %v127_v5 = vpop.f32.mrf.mxu0 }
  0xe8   :  { %v128_v17 = vadd.f32 %v745_v4, %v127_v5 }
  0xed   :  { %v923_v9 = vpop.f32.mrf.mxu1 }
  0xee   :  { %v295_v21 = vadd.f32 %v923_v9, %v138_v11 }
  0xef   :  { %v288_v16 = vpop.f32.mrf.mxu1 }
  0xf0   :  { %v289_v23 = vadd.f32 %v288_v16, %v128_v17 }
 0x106   :  { %v958_v10 = vpop.f32.mrf.mxu0 }
 0x107   :  { %v406_v24 = vadd.f32 %v958_v10, %v295_v21 }
 0x108   :  { %v398_v19 = vpop.f32.mrf.mxu0 }
 0x109   :  { %v399_v27 = vadd.f32 %v398_v19, %v289_v23 }
 0x10f   :  { %v993_v20 = vpop.f32.mrf.mxu1 }
 0x110   :  { %v503_v28 = vadd.f32 %v993_v20, %v406_v24 }
 0x111   :  { %v494_v26 = vpop.f32.mrf.mxu1 }
 0x112   :  { %v495_v33 = vadd.f32 %v494_v26, %v399_v27 }
 0x128   :  { %v1028_v22 = vpop.f32.mrf.mxu0 }
 0x129   :  { %v628_v34 = vadd.f32 %v1028_v22, %v503_v28 }
 0x12a   :  { %v621_v29 = vpop.f32.mrf.mxu0 }
 0x12b   :  { %v622_v42 = vadd.f32 %v621_v29, %v495_v33 }
 0x131   :  { %v1063_v39 = vpop.f32.mrf.mxu1 }
 0x132   :  { %v721_v43 = vadd.f32 %v1063_v39, %v628_v34 }
 0x133   :  { %v714_v45 = vpop.f32.mrf.mxu1 }
 0x134   :  { %v725_v46 = vmax.f32 %v721_v43, 0.0  ;;  %v715_v47 = vadd.f32 %v714_v45, %v622_v42 }
 0x136   :  { %728 = vst.msk [vmem:[#allocation2 + $0x8] sm:$0xff] %vm726_vm0, %v725_v46  ;;  %v724_v52 = vmax.f32 %v715_v47, 0.0 }
 0x138   :  { %727 = vst.msk [vmem:[#allocation2] sm:$0xff] %vm726_vm0, %v724_v52 }
 0x139   :  { %1078 = shalt.err (!%p1075_p4)
}
 0x13a   :  { %s1090_s23 = smov 128   ;;  %s1091_s24 = smov 8  }
 0x13b   :  { %740 = dma.vmem_to_hbm [thread:$0]  %s735_s21, 256, %s1525_s3, [#allocation3], %s1090_s23, %s1090_s23, %s1091_s24  }
 0x13c   :  { %1087 = dma.done.wait [#allocation3], 256  }
 0x13d   :  { %1088 = vsyncadd [#allocation3], 4294967040 }
 0x13e   :  { %744 = vsyncpa [#allocation3], 1 }

</bundles_post_ra>
